<compile_context>
chip_gen: v7x
topology: tpu7x:2x2x1
jax: 0.10.0
libtpu: 0.0.40
codegen_flags: <defaults>
</compile_context>

<pallas_src>
import functools

import jax
import jax.numpy as jnp
from jax import lax
from jax.experimental import pallas as pl
from jax.experimental.pallas import tpu as pltpu

# Module config (the nn.Module stored these in __init__).
QUANTILES = (0.1, 0.5, 0.9)
WEIGHTS = (1.0, 1.0, 1.0)
# The PyTorch reference hard-codes preds[:, :, 2] for the high-value penalty (it does
# NOT look up quantile 0.9 by value), so mirror that with a named constant.
HIGH_VALUE_PRED_INDEX = 2
HIGH_VALUE_WEIGHT = 3.0

LANE = 128
MAX_TILE_ROWS = 1024        # 1024x128 f32 tiles; ~7 MiB double-buffered on all gens.
FAST_PATH_MAX_ROWS = 1024   # below this the whole problem fits in VMEM -> fused kernel.
PARTIAL_ROWS = 8            # partials = one full (8, 128) vreg per tile (single store).


# --------------------------------------------------------------------------- kernels


def _phase1_kernel(preds_ref, target_ref, *out_refs, n, write_losses):
    """Tiled pinball pass over one (tile_rows, 128) row tile.

    preds_ref   : (Q, tile_rows, 128) VMEM  quantile-major predictions
    target_ref  : (tile_rows, 128)    VMEM
    out_refs    : [losses_ref (Q, tile_rows, 128) if write_losses], partials_ref (1, 8, 128)
      partials rows: 0 = pinball lane sums, 1 = sum(t) lane sums,
                     2 = sum((t - mu_tile)^2) lane sums, 3 = mu_tile (broadcast),
                     4..7 = zeros (pad to a full-vreg unmasked store).
    Tail tiles of the uneven grid read unspecified rows; everything feeding a
    reduction is masked with flat_index < n, and out-of-bounds loss-map rows are
    dropped by the pipeline on write-back.
    """
    if write_losses:
        losses_ref, partials_ref = out_refs
    else:
        (partials_ref,) = out_refs

    t = target_ref[...]
    tile_rows, lane = t.shape
    row_base = pl.program_id(0) * tile_rows
    row_ids = lax.broadcasted_iota(jnp.int32, t.shape, 0)
    lane_ids = lax.broadcasted_iota(jnp.int32, t.shape, 1)
    valid = (row_base + row_ids) * lane + lane_ids < n

    total = jnp.zeros_like(t)
    for i, q in enumerate(QUANTILES):                 # static unroll, Q == 3
        errors = t - preds_ref[i]
        # pinball: max((q-1)*e, q*e) == e * (q if e >= 0 else q-1)  for 0 < q < 1
        ql = errors * jnp.where(errors >= 0.0, q, q - 1.0)
        if WEIGHTS[i] != 1.0:                         # skip mul for unit weights
            ql = WEIGHTS[i] * ql
        if write_losses:
            losses_ref[i] = ql
        total = total + ql

    total = jnp.where(valid, total, 0.0)
    t_masked = jnp.where(valid, t, 0.0)

    pinball_row = jnp.sum(total, axis=0, keepdims=True)            # (1, 128)
    sum_row = jnp.sum(t_masked, axis=0, keepdims=True)             # (1, 128)
    tile_sum = jnp.sum(sum_row, axis=1, keepdims=True)             # (1, 1)
    cnt = jnp.clip(n - row_base * lane, 0, tile_rows * lane).astype(jnp.float32)
    mu = tile_sum / jnp.maximum(cnt, 1.0)                          # (1, 1) tile mean
    m2_row = jnp.sum(jnp.where(valid, (t - mu) ** 2, 0.0), axis=0, keepdims=True)
    mu_row = jnp.broadcast_to(mu, (1, lane))

    partials_ref[0] = jnp.concatenate(
        [pinball_row, sum_row, m2_row, mu_row,
         jnp.zeros((PARTIAL_ROWS - 4, lane), jnp.float32)],
        axis=0,
    )


def _phase2_kernel(thr_ref, target_ref, pred_hi_ref, hv_ref, *, n):
    """High-value-penalty pass: per-tile lane partials of |t - p| * [t > thr]."""
    t = target_ref[...]
    tile_rows, lane = t.shape
    row_base = pl.program_id(0) * tile_rows
    row_ids = lax.broadcasted_iota(jnp.int32, t.shape, 0)
    lane_ids = lax.broadcasted_iota(jnp.int32, t.shape, 1)
    valid = (row_base + row_ids) * lane + lane_ids < n

    err = jnp.abs(t - pred_hi_ref[0])
    hv = jnp.where(jnp.logical_and(valid, t > thr_ref[0]), err, 0.0)
    hv_ref[0] = jnp.sum(hv, axis=0, keepdims=True)


def _fused_kernel(preds_ref, target_ref, *out_refs, n, write_losses):
    """Single-shot path (small n): pinball + threshold + high-value penalty in VMEM."""
    if write_losses:
        losses_ref, loss_ref = out_refs
    else:
        (loss_ref,) = out_refs

    t = target_ref[...]
    rows, lane = t.shape
    row_ids = lax.broadcasted_iota(jnp.int32, t.shape, 0)
    lane_ids = lax.broadcasted_iota(jnp.int32, t.shape, 1)
    valid = row_ids * lane + lane_ids < n

    total = jnp.zeros_like(t)
    for i, q in enumerate(QUANTILES):
        errors = t - preds_ref[i]
        ql = errors * jnp.where(errors >= 0.0, q, q - 1.0)
        if WEIGHTS[i] != 1.0:
            ql = WEIGHTS[i] * ql
        if write_losses:
            losses_ref[i] = ql
        total = total + ql

    total = jnp.where(valid, total, 0.0)
    t_masked = jnp.where(valid, t, 0.0)
    inv_n = 1.0 / n

    pinball_sum = jnp.sum(jnp.sum(total, axis=0, keepdims=True), axis=1, keepdims=True)
    sum_t = jnp.sum(jnp.sum(t_masked, axis=0, keepdims=True), axis=1, keepdims=True)
    mean = sum_t * inv_n
    sq = jnp.where(valid, (t - mean) ** 2, 0.0)
    m2 = jnp.sum(jnp.sum(sq, axis=0, keepdims=True), axis=1, keepdims=True)
    var = m2 / max(n - 1, 1)                                   # torch.std: unbiased
    thr = mean + jnp.sqrt(var)

    hv = jnp.where(jnp.logical_and(valid, t > thr),
                   jnp.abs(t - preds_ref[HIGH_VALUE_PRED_INDEX]), 0.0)
    hv_sum = jnp.sum(jnp.sum(hv, axis=0, keepdims=True), axis=1, keepdims=True)

    loss = pinball_sum * inv_n + HIGH_VALUE_WEIGHT * hv_sum * inv_n
    loss_ref[...] = jnp.broadcast_to(loss, loss_ref.shape)


# --------------------------------------------------------------------------- wrapper


def _lane_rows(x_flat, rows):
    """Reshape (..., n) -> (..., rows, 128); pads only when n % 128 != 0."""
    n = x_flat.shape[-1]
    pad = rows * LANE - n
    if pad:
        x_flat = jnp.pad(x_flat, [(0, 0)] * (x_flat.ndim - 1) + [(0, pad)])
    return x_flat.reshape(x_flat.shape[:-1] + (rows, LANE))


def _fused_call(preds_rows, tgt_rows, n, ret_losses):
    Q, rows, _ = preds_rows.shape
    out_shape = [jax.ShapeDtypeStruct((PARTIAL_ROWS, LANE), jnp.float32)]
    if ret_losses:
        out_shape = [jax.ShapeDtypeStruct((Q, rows, LANE), jnp.float32)] + out_shape

    loss_write_bytes = Q * rows * LANE * 4 if ret_losses else 0
    cost = pl.CostEstimate(
        flops=(6 * Q + 16) * rows * LANE,
        transcendentals=1,
        bytes_accessed=(Q + 1) * rows * LANE * 4 + loss_write_bytes
        + PARTIAL_ROWS * LANE * 4,
    )
    outs = pl.pallas_call(
        functools.partial(_fused_kernel, n=n, write_losses=ret_losses),
        out_shape=out_shape,
        cost_estimate=cost,
    )(preds_rows, tgt_rows)

    if ret_losses:
        losses_rows, loss_block = outs
    else:
        (loss_block,) = outs
        losses_rows = None
    return loss_block[0, 0], losses_rows


def _tiled_call(preds_rows, tgt_rows, n, ret_losses):
    Q, rows, _ = preds_rows.shape
    tile_rows = min(MAX_TILE_ROWS, ((rows + 7) // 8) * 8)
    num_tiles = pl.cdiv(rows, tile_rows)      # uneven grid; tail masked in-kernel
    tile_elems = tile_rows * LANE

    out_specs = [pl.BlockSpec((1, PARTIAL_ROWS, LANE), lambda i: (i, 0, 0))]
    out_shape = [jax.ShapeDtypeStruct((num_tiles, PARTIAL_ROWS, LANE), jnp.float32)]
    if ret_losses:
        out_specs = [pl.BlockSpec((Q, tile_rows, LANE), lambda i: (0, i, 0))] + out_specs
        out_shape = [jax.ShapeDtypeStruct((Q, rows, LANE), jnp.float32)] + out_shape

    loss_write_bytes = Q * rows * LANE * 4 if ret_losses else 0
    cost1 = pl.CostEstimate(
        flops=(6 * Q + 12) * rows * LANE,
        transcendentals=0,
        bytes_accessed=(Q + 1) * rows * LANE * 4 + loss_write_bytes
        + num_tiles * PARTIAL_ROWS * LANE * 4,
    )
    outs = pl.pallas_call(
        functools.partial(_phase1_kernel, n=n, write_losses=ret_losses),
        grid=(num_tiles,),
        in_specs=[
            pl.BlockSpec((Q, tile_rows, LANE), lambda i: (0, i, 0)),
            pl.BlockSpec((tile_rows, LANE), lambda i: (i, 0)),
        ],
        out_specs=out_specs,
        out_shape=out_shape,
        compiler_params=pltpu.CompilerParams(dimension_semantics=("parallel",)),
        cost_estimate=cost1,
    )(preds_rows, tgt_rows)

    if ret_losses:
        losses_rows, partials = outs
    else:
        (partials,) = outs
        losses_rows = None

    # Finish the tiny scalar reductions in the wrapper graph (true count n, so lane
    # padding / masked tail rows never shift the means).
    pinball_sum = jnp.sum(partials[:, 0, :])
    sum_t = jnp.sum(partials[:, 1, :])
    mean = sum_t / n
    # Chunked variance (per-tile centered M2 + between-tile correction): numerically
    # robust replacement for sum-of-squares; matches torch.std's unbiased estimator.
    counts = jnp.clip(
        n - jnp.arange(num_tiles, dtype=jnp.int32) * tile_elems, 0, tile_elems
    ).astype(jnp.float32)
    mu_tiles = partials[:, 3, 0]
    m2 = jnp.sum(partials[:, 2, :]) + jnp.sum(counts * (mu_tiles - mean) ** 2)
    var = m2 / max(n - 1, 1)
    thr = (mean + jnp.sqrt(var)).reshape(1)

    cost2 = pl.CostEstimate(
        flops=8 * rows * LANE,
        transcendentals=0,
        bytes_accessed=2 * rows * LANE * 4 + num_tiles * LANE * 4,
    )
    hv_partials = pl.pallas_call(
        functools.partial(_phase2_kernel, n=n),
        grid=(num_tiles,),
        in_specs=[
            pl.BlockSpec(memory_space=pltpu.MemorySpace.SMEM),                # thr (1,)
            pl.BlockSpec((tile_rows, LANE), lambda i: (i, 0)),                # target
            pl.BlockSpec((1, tile_rows, LANE),
                         lambda i: (HIGH_VALUE_PRED_INDEX, i, 0)),            # preds[2]
        ],
        out_specs=pl.BlockSpec((1, 1, LANE), lambda i: (i, 0, 0)),
        out_shape=jax.ShapeDtypeStruct((num_tiles, 1, LANE), jnp.float32),
        compiler_params=pltpu.CompilerParams(dimension_semantics=("parallel",)),
        cost_estimate=cost2,
    )(thr, tgt_rows, preds_rows)

    loss = pinball_sum / n + HIGH_VALUE_WEIGHT * jnp.sum(hv_partials) / n
    return loss, losses_rows


def _forward_impl(preds_qbt, target, ret_losses):
    Q, B, T = preds_qbt.shape
    assert target.shape == (B, T)
    assert Q == len(QUANTILES) and Q > HIGH_VALUE_PRED_INDEX

    n = B * T
    rows = pl.cdiv(n, LANE)

    preds_qbt = preds_qbt.astype(jnp.float32)
    target = target.astype(jnp.float32)

    # Lane-dense layout (last dim = 128); free reshapes when n % 128 == 0.
    tgt_rows = _lane_rows(target.reshape(n), rows)
    preds_rows = _lane_rows(preds_qbt.reshape(Q, n), rows)

    if rows <= FAST_PATH_MAX_ROWS:
        loss, losses_rows = _fused_call(preds_rows, tgt_rows, n, ret_losses)
    else:
        loss, losses_rows = _tiled_call(preds_rows, tgt_rows, n, ret_losses)

    if not ret_losses:
        return loss
    if rows * LANE == n:
        losses_qbt = losses_rows.reshape(Q, B, T)                 # free reshape
    else:
        losses_qbt = losses_rows.reshape(Q, rows * LANE)[:, :n].reshape(Q, B, T)
    return loss, losses_qbt


@functools.partial(jax.jit, static_argnames=("ret_losses",))
def quantile_loss_forward(preds, target, ret_losses=True):
    """preds: (B, T, Q) float (PyTorch layout), target: (B, T).

    Returns (loss, (Q, B, T) weighted loss maps) if ret_losses else loss.  The maps
    are stacked quantile-major; the PyTorch list-of-(B, 1, T) view is
    losses[i][:, None, :] with no extra HBM pass.
    """
    # TODO(synk): this transpose is the largest HBM consumer outside the kernels;
    # callers that can produce quantile-major preds should use
    # quantile_loss_forward_qmajor() and skip it entirely.
    preds_qbt = jnp.transpose(preds, (2, 0, 1))
    return _forward_impl(preds_qbt, target, ret_losses)


@functools.partial(jax.jit, static_argnames=("ret_losses",))
def quantile_loss_forward_qmajor(preds_qbt, target, ret_losses=True):
    """Same loss, but takes predictions already quantile-major as (Q, B, T)."""
    return _forward_impl(preds_qbt, target, ret_losses)


# ------------------------------------------------------------------------ verification


def _reference_forward(preds, target):
    """Pure-JAX reference mirroring the PyTorch forward."""
    losses = []
    for i, q in enumerate(QUANTILES):
        errors = target - preds[:, :, i]
        ql = jnp.maximum((q - 1.0) * errors, q * errors)[:, None, :]
        losses.append(WEIGHTS[i] * ql)
    loss = jnp.mean(jnp.sum(jnp.concatenate(losses, axis=1), axis=1))
    n = target.size
    t_mean = jnp.mean(target)
    t_std = jnp.sqrt(jnp.sum((target - t_mean) ** 2) / max(n - 1, 1))
    mask = (target > t_mean + t_std).astype(target.dtype)
    hve = jnp.abs(target - preds[:, :, HIGH_VALUE_PRED_INDEX]) * mask
    return loss + jnp.mean(hve) * HIGH_VALUE_WEIGHT, losses


def _check(B, T, seed, loss_tol=1e-5):
    key = jax.random.PRNGKey(seed)
    k1, k2 = jax.random.split(key)
    Q = len(QUANTILES)
    preds = jax.random.normal(k1, (B, T, Q), dtype=jnp.float32)
    target = jax.random.normal(k2, (B, T), dtype=jnp.float32)

    loss, losses = quantile_loss_forward(preds, target, ret_losses=True)
    loss = jax.block_until_ready(loss)
    losses = jax.block_until_ready(losses)

    ref_loss, ref_losses = _reference_forward(preds, target)
    assert jnp.allclose(loss, ref_loss, rtol=loss_tol, atol=loss_tol), (B, T, loss, ref_loss)
    assert losses.shape == (Q, B, T)
    for i in range(Q):
        assert jnp.allclose(losses[i], ref_losses[i][:, 0, :], rtol=1e-5, atol=1e-5), (B, T, i)

    # Scalar-only mode (skips the loss-map HBM write entirely).
    loss_only = jax.block_until_ready(
        quantile_loss_forward(preds, target, ret_losses=False))
    assert jnp.allclose(loss_only, ref_loss, rtol=loss_tol, atol=loss_tol), (B, T, loss_only)

    # Quantile-major entry point (no (B, T, Q) -> (Q, B, T) transpose copy).
    loss_qm, _ = quantile_loss_forward_qmajor(
        jnp.transpose(preds, (2, 0, 1)), target, ret_losses=True)
    loss_qm = jax.block_until_ready(loss_qm)
    assert jnp.allclose(loss_qm, ref_loss, rtol=loss_tol, atol=loss_tol), (B, T, loss_qm)


if __name__ == "__main__":
    _check(B=2, T=8, seed=0)                     # tiny: fused single-shot path
    _check(B=4, T=200, seed=0)                   # fused path with lane padding (n % 128 != 0)
    # Large-n checks use a looser scalar tolerance: a ~1e-6 difference in the
    # threshold between reduction orders can flip a single mask element.
    _check(B=8, T=20000, seed=0, loss_tol=2e-4)  # tiled path, uneven tail tile, no lane pad
    _check(B=3, T=50000, seed=0, loss_tol=2e-4)  # tiled path with lane padding
    print("KERNEL_OK")
</pallas_src>

<mosaic_0001>
module attributes {stable_mosaic.version = 11 : i64} {
  func.func @_fused_kernel(%arg0: memref<3x1x128xf32, #tpu.memory_space<vmem>>, %arg1: memref<1x128xf32, #tpu.memory_space<vmem>>, %arg2: memref<3x1x128xf32, #tpu.memory_space<vmem>>, %arg3: memref<8x128xf32, #tpu.memory_space<vmem>>) attributes {dimension_semantics = [], scalar_prefetch = 0 : i64, scratch_operands = 0 : i64, tpu.core_type = #tpu.core_type<tc>} {
    %c0 = arith.constant 0 : index
    %c0_0 = arith.constant 0 : index
    %0 = vector.load %arg1[%c0, %c0_0] : memref<1x128xf32, #tpu.memory_space<vmem>>, vector<1x128xf32>
    %1 = tpu.iota {dimensions = array<i32: 0>} : vector<1x128xi32>
    %2 = tpu.iota {dimensions = array<i32: 1>} : vector<1x128xi32>
    %c128_i32 = arith.constant 128 : i32
    %3 = vector.broadcast %c128_i32 : i32 to vector<1x128xi32>
    %4 = arith.muli %1, %3 : vector<1x128xi32>
    %5 = arith.addi %4, %2 : vector<1x128xi32>
    %c16_i32 = arith.constant 16 : i32
    %6 = vector.broadcast %c16_i32 : i32 to vector<1x128xi32>
    %7 = arith.cmpi slt, %5, %6 : vector<1x128xi32>
    %cst = arith.constant 0.000000e+00 : f32
    %8 = vector.broadcast %cst : f32 to vector<1x128xf32>
    %c0_1 = arith.constant 0 : index
    %c0_2 = arith.constant 0 : index
    %c0_3 = arith.constant 0 : index
    %9 = vector.load %arg0[%c0_1, %c0_2, %c0_3] : memref<3x1x128xf32, #tpu.memory_space<vmem>>, vector<1x1x128xf32>
    %10 = vector.shape_cast %9 : vector<1x1x128xf32> to vector<1x128xf32>
    %11 = arith.subf %0, %10 : vector<1x128xf32>
    %cst_4 = arith.constant 0.000000e+00 : f32
    %12 = vector.broadcast %cst_4 : f32 to vector<1x128xf32>
    %13 = arith.cmpf oge, %11, %12 : vector<1x128xf32>
    %cst_5 = arith.constant 1.000000e-01 : f32
    %cst_6 = arith.constant -0.899999976 : f32
    %14 = vector.broadcast %cst_5 : f32 to vector<1x128xf32>
    %15 = vector.broadcast %cst_6 : f32 to vector<1x128xf32>
    %16 = arith.select %13, %14, %15 : vector<1x128xi1>, vector<1x128xf32>
    %17 = arith.mulf %11, %16 : vector<1x128xf32>
    %c0_7 = arith.constant 0 : index
    %c0_8 = arith.constant 0 : index
    %c0_9 = arith.constant 0 : index
    %18 = vector.load %arg2[%c0_7, %c0_8, %c0_9] : memref<3x1x128xf32, #tpu.memory_space<vmem>>, vector<1x1x128xf32>
    %19 = vector.shape_cast %18 : vector<1x1x128xf32> to vector<1x128xf32>
    %20 = vector.shape_cast %17 : vector<1x128xf32> to vector<1x1x128xf32>
    tpu.vector_store %arg2[%c0_7, %c0_8, %c0_9], %20 {strides = array<i32>} : memref<3x1x128xf32, #tpu.memory_space<vmem>>, vector<1x1x128xf32>,
    %21 = arith.addf %8, %17 : vector<1x128xf32>
    %c1 = arith.constant 1 : index
    %c0_10 = arith.constant 0 : index
    %c0_11 = arith.constant 0 : index
    %22 = vector.load %arg0[%c1, %c0_10, %c0_11] : memref<3x1x128xf32, #tpu.memory_space<vmem>>, vector<1x1x128xf32>
    %23 = vector.shape_cast %22 : vector<1x1x128xf32> to vector<1x128xf32>
    %24 = arith.subf %0, %23 : vector<1x128xf32>
    %cst_12 = arith.constant 0.000000e+00 : f32
    %25 = vector.broadcast %cst_12 : f32 to vector<1x128xf32>
    %26 = arith.cmpf oge, %24, %25 : vector<1x128xf32>
    %cst_13 = arith.constant 5.000000e-01 : f32
    %cst_14 = arith.constant -5.000000e-01 : f32
    %27 = vector.broadcast %cst_13 : f32 to vector<1x128xf32>
    %28 = vector.broadcast %cst_14 : f32 to vector<1x128xf32>
    %29 = arith.select %26, %27, %28 : vector<1x128xi1>, vector<1x128xf32>
    %30 = arith.mulf %24, %29 : vector<1x128xf32>
    %c1_15 = arith.constant 1 : index
    %c0_16 = arith.constant 0 : index
    %c0_17 = arith.constant 0 : index
    %31 = vector.load %arg2[%c1_15, %c0_16, %c0_17] : memref<3x1x128xf32, #tpu.memory_space<vmem>>, vector<1x1x128xf32>
    %32 = vector.shape_cast %31 : vector<1x1x128xf32> to vector<1x128xf32>
    %33 = vector.shape_cast %30 : vector<1x128xf32> to vector<1x1x128xf32>
    tpu.vector_store %arg2[%c1_15, %c0_16, %c0_17], %33 {strides = array<i32>} : memref<3x1x128xf32, #tpu.memory_space<vmem>>, vector<1x1x128xf32>,
    %34 = arith.addf %21, %30 : vector<1x128xf32>
    %c2 = arith.constant 2 : index
    %c0_18 = arith.constant 0 : index
    %c0_19 = arith.constant 0 : index
    %35 = vector.load %arg0[%c2, %c0_18, %c0_19] : memref<3x1x128xf32, #tpu.memory_space<vmem>>, vector<1x1x128xf32>
    %36 = vector.shape_cast %35 : vector<1x1x128xf32> to vector<1x128xf32>
    %37 = arith.subf %0, %36 : vector<1x128xf32>
    %cst_20 = arith.constant 0.000000e+00 : f32
    %38 = vector.broadcast %cst_20 : f32 to vector<1x128xf32>
    %39 = arith.cmpf oge, %37, %38 : vector<1x128xf32>
    %cst_21 = arith.constant 0.899999976 : f32
    %cst_22 = arith.constant -1.000000e-01 : f32
    %40 = vector.broadcast %cst_21 : f32 to vector<1x128xf32>
    %41 = vector.broadcast %cst_22 : f32 to vector<1x128xf32>
    %42 = arith.select %39, %40, %41 : vector<1x128xi1>, vector<1x128xf32>
    %43 = arith.mulf %37, %42 : vector<1x128xf32>
    %c2_23 = arith.constant 2 : index
    %c0_24 = arith.constant 0 : index
    %c0_25 = arith.constant 0 : index
    %44 = vector.load %arg2[%c2_23, %c0_24, %c0_25] : memref<3x1x128xf32, #tpu.memory_space<vmem>>, vector<1x1x128xf32>
    %45 = vector.shape_cast %44 : vector<1x1x128xf32> to vector<1x128xf32>
    %46 = vector.shape_cast %43 : vector<1x128xf32> to vector<1x1x128xf32>
    tpu.vector_store %arg2[%c2_23, %c0_24, %c0_25], %46 {strides = array<i32>} : memref<3x1x128xf32, #tpu.memory_space<vmem>>, vector<1x1x128xf32>,
    %47 = arith.addf %34, %43 : vector<1x128xf32>
    %cst_26 = arith.constant 0.000000e+00 : f32
    %48 = vector.broadcast %cst_26 : f32 to vector<1x128xf32>
    %49 = arith.select %7, %47, %48 : vector<1x128xi1>, vector<1x128xf32>
    %cst_27 = arith.constant 0.000000e+00 : f32
    %50 = vector.broadcast %cst_27 : f32 to vector<1x128xf32>
    %51 = arith.select %7, %0, %50 : vector<1x128xi1>, vector<1x128xf32>
    %cst_28 = arith.constant dense<0.000000e+00> : vector<128xf32>
    %52 = vector.multi_reduction <add>, %49, %cst_28 [0] : vector<1x128xf32> to vector<128xf32>
    %53 = vector.shape_cast %52 : vector<128xf32> to vector<1x128xf32>
    %cst_29 = arith.constant dense<0.000000e+00> : vector<1xf32>
    %54 = vector.multi_reduction <add>, %53, %cst_29 [1] : vector<1x128xf32> to vector<1xf32>
    %55 = vector.shape_cast %54 : vector<1xf32> to vector<1x1xf32>
    %cst_30 = arith.constant dense<0.000000e+00> : vector<128xf32>
    %56 = vector.multi_reduction <add>, %51, %cst_30 [0] : vector<1x128xf32> to vector<128xf32>
    %57 = vector.shape_cast %56 : vector<128xf32> to vector<1x128xf32>
    %cst_31 = arith.constant dense<0.000000e+00> : vector<1xf32>
    %58 = vector.multi_reduction <add>, %57, %cst_31 [1] : vector<1x128xf32> to vector<1xf32>
    %59 = vector.shape_cast %58 : vector<1xf32> to vector<1x1xf32>
    %cst_32 = arith.constant 6.250000e-02 : f32
    %60 = vector.broadcast %cst_32 : f32 to vector<1x1xf32>
    %61 = arith.mulf %59, %60 : vector<1x1xf32>
    %62 = vector.broadcast %61 : vector<1x1xf32> to vector<1x128xf32>
    %63 = arith.subf %0, %62 : vector<1x128xf32>
    %64 = arith.mulf %63, %63 : vector<1x128xf32>
    %cst_33 = arith.constant 0.000000e+00 : f32
    %65 = vector.broadcast %cst_33 : f32 to vector<1x128xf32>
    %66 = arith.select %7, %64, %65 : vector<1x128xi1>, vector<1x128xf32>
    %cst_34 = arith.constant dense<0.000000e+00> : vector<128xf32>
    %67 = vector.multi_reduction <add>, %66, %cst_34 [0] : vector<1x128xf32> to vector<128xf32>
    %68 = vector.shape_cast %67 : vector<128xf32> to vector<1x128xf32>
    %cst_35 = arith.constant dense<0.000000e+00> : vector<1xf32>
    %69 = vector.multi_reduction <add>, %68, %cst_35 [1] : vector<1x128xf32> to vector<1xf32>
    %70 = vector.shape_cast %69 : vector<1xf32> to vector<1x1xf32>
    %cst_36 = arith.constant 1.500000e+01 : f32
    %71 = vector.broadcast %cst_36 : f32 to vector<1x1xf32>
    %72 = arith.divf %70, %71 : vector<1x1xf32>
    %73 = math.sqrt %72 : vector<1x1xf32>
    %74 = arith.addf %61, %73 : vector<1x1xf32>
    %75 = vector.broadcast %74 : vector<1x1xf32> to vector<1x128xf32>
    %76 = arith.cmpf ogt, %0, %75 : vector<1x128xf32>
    %77 = arith.andi %7, %76 : vector<1x128xi1>
    %c2_37 = arith.constant 2 : index
    %c0_38 = arith.constant 0 : index
    %c0_39 = arith.constant 0 : index
    %78 = vector.load %arg0[%c2_37, %c0_38, %c0_39] : memref<3x1x128xf32, #tpu.memory_space<vmem>>, vector<1x1x128xf32>
    %79 = vector.shape_cast %78 : vector<1x1x128xf32> to vector<1x128xf32>
    %80 = arith.subf %0, %79 : vector<1x128xf32>
    %81 = math.absf %80 : vector<1x128xf32>
    %cst_40 = arith.constant 0.000000e+00 : f32
    %82 = vector.broadcast %cst_40 : f32 to vector<1x128xf32>
    %83 = arith.select %77, %81, %82 : vector<1x128xi1>, vector<1x128xf32>
    %cst_41 = arith.constant dense<0.000000e+00> : vector<128xf32>
    %84 = vector.multi_reduction <add>, %83, %cst_41 [0] : vector<1x128xf32> to vector<128xf32>
    %85 = vector.shape_cast %84 : vector<128xf32> to vector<1x128xf32>
    %cst_42 = arith.constant dense<0.000000e+00> : vector<1xf32>
    %86 = vector.multi_reduction <add>, %85, %cst_42 [1] : vector<1x128xf32> to vector<1xf32>
    %87 = vector.shape_cast %86 : vector<1xf32> to vector<1x1xf32>
    %cst_43 = arith.constant 6.250000e-02 : f32
    %88 = vector.broadcast %cst_43 : f32 to vector<1x1xf32>
    %89 = arith.mulf %55, %88 : vector<1x1xf32>
    %cst_44 = arith.constant 3.000000e+00 : f32
    %90 = vector.broadcast %cst_44 : f32 to vector<1x1xf32>
    %91 = arith.mulf %90, %87 : vector<1x1xf32>
    %cst_45 = arith.constant 6.250000e-02 : f32
    %92 = vector.broadcast %cst_45 : f32 to vector<1x1xf32>
    %93 = arith.mulf %91, %92 : vector<1x1xf32>
    %94 = arith.addf %89, %93 : vector<1x1xf32>
    %95 = vector.shape_cast %94 : vector<1x1xf32> to vector<1x1xf32>
    %96 = vector.broadcast %95 : vector<1x1xf32> to vector<8x128xf32>
    %c0_46 = arith.constant 0 : index
    %c0_47 = arith.constant 0 : index
    %97 = vector.load %arg3[%c0_46, %c0_47] : memref<8x128xf32, #tpu.memory_space<vmem>>, vector<8x128xf32>
    tpu.vector_store %arg3[%c0_46, %c0_47], %96 {strides = array<i32>} : memref<8x128xf32, #tpu.memory_space<vmem>>, vector<8x128xf32>,
    return
  }
}

</mosaic_0001>

<bundles_post_ra>
// kernel: quantile_loss_forward.1
= control target key start
LH: loop header
LB: loop body
LE: loop exit
PB: predicated region body
PF: predicated region fallthrough
CT: control target
= control target key end

     0   :  { %v14_v0 = vlaneseq  ;;  %vm49_vm0 = vcmask 1040384   ;;  %v112_v19 = vmov -0.9   ;;  %v113_v23 = vmov -0.5   ;;  %s174_s1 = inlined_call_operand.vmem [shape: f32[1,128], index: 1, kind: input, shape index: {}]   ;;  %s175_s0 = inlined_call_operand.vmem [shape: f32[3,1,128], index: 0, kind: input, shape index: {}]   ;;  %s176_s2 = inlined_call_operand.vmem [shape: f32[3,1,128], index: 2, kind: output, shape index: {0}]   ;;  %s177_s3 = inlined_call_operand.vmem [shape: f32[8,128], index: 3, kind: output, shape index: {1}]  }
   0x1   :  { %v13_v4 = vld [vmem:[%s174_s1] sm:$0x1]  ;;  %v102_v15 = vld [vmem:[%s175_s0 + $0x1] sm:$0x1]  ;;  %v104_v18 = vld [vmem:[%s175_s0 + $0x2] sm:$0x1] }
   0x2   :  { %v135_v1 = vshrl.u32 %v14_v0, 7  ;;  %v17_v2 = vand.u32 127, %v14_v0  ;;  %v21_v14 = vld [vmem:[%s175_s0] sm:$0x1]  ;;  %v30_v17 = vsub.f32 %v13_v4, %v102_v15  ;;  %v39_v21 = vsub.f32 %v13_v4, %v104_v18  ;;  %v106_v33 = vld [vmem:[%s175_s0 + $0x2] sm:$0x1] }
   0x3   :  { %v22_v16 = vsub.f32 %v13_v4, %v21_v14  ;;  %v114_v26 = vmov -0.1   ;;  %v78_v36 = vsub.f32 %v13_v4, %v106_v33 }
   0x4   :  { %v18_v3 = vmul.u32 128, %v135_v1  ;;  %vm31_vm3 = vcmp.ge.f32.partialorder %v30_v17, 0.0  ;;  %vm40_vm4 = vcmp.ge.f32.partialorder %v39_v21, 0.0  ;;  %v91_v50 = vsub.s32 0, %v135_v1 }
   0x5   :  { %vm23_vm2 = vcmp.ge.f32.partialorder %v22_v16, 0.0  ;;  %v32_v24 = vsel %vm31_vm3, 0.5, %v113_v23  ;;  %v41_v27 = vsel %vm40_vm4, 0.9, %v114_v26  ;;  %v79_v41 = vand.u32 2147483647, %v78_v36 }
   0x6   :  { %v19_v5 = vadd.s32 %v18_v3, %v17_v2  ;;  %v24_v20 = vsel %vm23_vm2, 0.1, %v112_v19  ;;  %v33_v25 = vmul.f32 %v32_v24, %v30_v17  ;;  %v42_v29 = vmul.f32 %v41_v27, %v39_v21 }
   0x7   :  { %v25_v22 = vmul.f32 %v24_v20, %v22_v16 }
   0x8   :  { %vm20_vm1 = vcmp.lt.s32.totalorder %v19_v5, 16  ;;  %103 = vst [vmem:[%s176_s2 + $0x1] sm:$0x1] %v33_v25  ;;  %105 = vst [vmem:[%s176_s2 + $0x2] sm:$0x1] %v42_v29 }
   0x9   :  { %v47_v6 = vsel %vm20_vm1, %v13_v4, 0.0  ;;  %v36_v28 = vadd.f32 %v33_v25, %v25_v22  ;;  %26 = vst [vmem:[%s176_s2] sm:$0x1] %v25_v22 }
   0xa   :  { %v54_v7 = vsel %vm49_vm0, %v47_v6, 0.0 }
   0xb   :  { %55 = vadd.xlane.f32.xlu0 %v54_v7  ;;  %v45_v30 = vadd.f32 %v42_v29, %v36_v28 }
   0xd   :  { %v46_v43 = vsel %vm20_vm1, %v45_v30, 0.0 }
   0xe   :  { %v50_v45 = vsel %vm49_vm0, %v46_v43, 0.0 }
  0x98   :  { %v56_v8 = vpop.xlane.xlu0 %55 }
  0x99   :  { %v57_v9 = vmul.f32 0.0625, %v56_v8 }
  0x9b   :  { %v58_v10 = vsub.f32 %v13_v4, %v57_v9 }
  0x9d   :  { %v59_v11 = vmul.f32 %v58_v10, %v58_v10 }
  0x9f   :  { %v60_v12 = vsel %vm20_vm1, %v59_v11, 0.0 }
  0xa0   :  { %v62_v13 = vsel %vm49_vm0, %v60_v12, 0.0 }
  0xa1   :  { %63 = vadd.xlane.f32.xlu0 %v62_v13 }
 0x12e   :  { %v64_v31 = vpop.xlane.xlu0 %63 }
 0x12f   :  { %v66_v32 = vmul.f32 0.06666667, %v64_v31 }
 0x131   :  { %110 = vrsqrt.f32 %v66_v32  ;;  %vm69_vm5 = vcmp.eq.f32.partialorder %v66_v32, inf  ;;  %v72_v37 = vand.u32 2147483648, %v66_v32  ;;  %vm71_vm6 = vcmp.eq.f32.partialorder %v66_v32, 0.0 }
 0x13b   :  { %v111_v34 = vpop.eup %110 }
 0x13c   :  { %v68_v35 = vmul.f32 %v111_v34, %v66_v32 }
 0x13e   :  { %v70_v38 = vsel %vm69_vm5, %v66_v32, %v68_v35 }
 0x13f   :  { %v73_v39 = vsel %vm71_vm6, %v72_v37, %v70_v38 }
 0x140   :  { %v74_v40 = vadd.f32 %v73_v39, %v57_v9 }
 0x142   :  { %vm75_vm7 = vcmp.gt.f32.partialorder %v13_v4, %v74_v40 }
 0x143   :  { %vm76_vm8 = vmand %vm20_vm1, %vm75_vm7 }
 0x144   :  { %v80_v42 = vsel %vm76_vm8, %v79_v41, 0.0 }
 0x145   :  { %v82_v44 = vsel %vm49_vm0, %v80_v42, 0.0 }
 0x146   :  { %83 = vadd.xlane.f32.xlu1 %v82_v44 }
 0x14a   :  { %51 = vadd.xlane.f32.xlu1 %v50_v45 }
 0x1d3   :  { %v84_v46 = vpop.xlane.xlu1 %83 }
 0x1d4   :  { %v86_v47 = vmul.f32 3.0, %v84_v46 }
 0x1d6   :  { %v87_v49 = vmul.f32 0.0625, %v86_v47 }
 0x1d7   :  { %v52_v48 = vpop.xlane.xlu1 %51 }
 0x1d8   :  { %v85_v51 = vmul.f32 0.0625, %v52_v48 }
 0x1da   :  { %v88_v52 = vadd.f32 %v87_v49, %v85_v51 }
 0x1dc   :  { %v92_v53 = vrot.slane %v88_v52, %v91_v50 }
 0x1de   :  { %93 = vst [vmem:[%s177_s3] sm:$0xff] %v92_v53 }

</bundles_post_ra>
